<compile_context>
chip_gen: v5e
topology: v5e:2x2
jax: 0.10.0
libtpu: 0.0.40
codegen_flags: <defaults>
</compile_context>

<pallas_src>
import functools

import jax
import jax.numpy as jnp
from jax.experimental import pallas as pl
from jax.experimental.pallas import tpu as pltpu


def _logit_cond_kernel(x_ref, up_ref, *, thres):
    # (TILE_N, C) tile resident in VMEM.  Numerically-stable softmax denominator
    # only: max(softmax(x)) == 1/denom, so compare denom directly.
    x = x_ref[...].astype(jnp.float32)                       # (TILE_N, C)
    row_max = jnp.max(x, axis=1, keepdims=True)              # (TILE_N, 1)
    denom = jnp.sum(jnp.exp(x - row_max), axis=1, keepdims=True)  # (TILE_N, 1)
    # 1/denom > thres  <=>  denom * thres < 1.0   (denom > 0 always)
    up_ref[...] = (denom * thres < 1.0).astype(jnp.int32)


def _pick_tile_n(n, c, itemsize):
    """Multiple-of-8 row tile so double-buffered input stays a few MiB."""
    target_bytes = 2 * 1024 * 1024  # per in-flight input tile (x2 for double buffer)
    t = (target_bytes // max(1, c * itemsize)) // 8 * 8
    t = max(8, min(1024, t))
    if t >= n:
        return n  # single tile == full rows (block equals full array dim)
    return t


def logit_cond(outputs, thres=1.0, tile_n=None):
    """Pallas equivalent of LogitCond.forward. Returns (cond_up, cond_down), both bool (N,)."""
    N, C = outputs.shape
    if tile_n is None:
        tile_n = _pick_tile_n(N, C, jnp.dtype(outputs.dtype).itemsize)

    up_i = pl.pallas_call(
        functools.partial(_logit_cond_kernel, thres=float(thres)),
        out_shape=jax.ShapeDtypeStruct((N, 1), jnp.int32),
        grid=(pl.cdiv(N, tile_n),),
        in_specs=[pl.BlockSpec((tile_n, C), lambda i: (i, 0))],
        out_specs=pl.BlockSpec((tile_n, 1), lambda i: (i, 0)),
        compiler_params=pltpu.CompilerParams(
            dimension_semantics=("parallel",)),
    )(outputs)

    cond_up = up_i.reshape(N) != 0
    cond_down = jnp.logical_not(cond_up)
    return cond_up, cond_down


def _reference(outputs, thres):
    logits = jax.nn.softmax(outputs.astype(jnp.float32), axis=1)
    max_logits = jnp.max(logits, axis=1)
    return max_logits > thres, max_logits <= thres


if __name__ == "__main__":
    key = jax.random.PRNGKey(0)
    N, C = 16, 32  # (batch, num_classes)
    outputs = jax.random.normal(key, (N, C), dtype=jnp.float32) * 3.0

    # thres=0.35 gives a non-trivial split (module default 1.0 -> all cond_down).
    thres = 0.35
    cond_up, cond_down = logit_cond(outputs, thres=thres)
    jax.block_until_ready((cond_up, cond_down))

    ref_up, ref_down = _reference(outputs, thres)
    assert cond_up.shape == (N,) and cond_up.dtype == jnp.bool_
    assert cond_down.shape == (N,) and cond_down.dtype == jnp.bool_
    assert bool(jnp.all(cond_up == ref_up))
    assert bool(jnp.all(cond_down == ref_down))
    assert bool(jnp.all(cond_up ^ cond_down))  # exactly one condition true per sample

    # Exercise the multi-tile (grid > 1) path with a forced small row tile.
    cu2, cd2 = logit_cond(outputs, thres=thres, tile_n=8)
    jax.block_until_ready((cu2, cd2))
    assert bool(jnp.all(cu2 == ref_up)) and bool(jnp.all(cd2 == ref_down))

    # Default threshold path (thres=1.0 -> max softmax <= 1 -> all cond_down).
    du, dd = logit_cond(outputs)
    jax.block_until_ready((du, dd))
    assert not bool(jnp.any(du)) and bool(jnp.all(dd))

    print("KERNEL_OK")
</pallas_src>

<mosaic_0001>
module attributes {stable_mosaic.version = 11 : i64} {
  func.func @_logit_cond_kernel(%arg0: i32, %arg1: memref<16x32xf32, #tpu.memory_space<vmem>>, %arg2: memref<16x1xi32, #tpu.memory_space<vmem>>) attributes {dimension_semantics = [#tpu.dimension_semantics<parallel>], iteration_bounds = array<i64: 1>, scalar_prefetch = 0 : i64, scratch_operands = 0 : i64, tpu.core_type = #tpu.core_type<tc>, window_params = [{transform_indices = @transform_0, window_bounds = array<i64: 16, 32>}, {transform_indices = @transform_1, window_bounds = array<i64: 16, 1>}]} {
    %c0 = arith.constant 0 : index
    %c0_0 = arith.constant 0 : index
    %0 = vector.load %arg1[%c0, %c0_0] : memref<16x32xf32, #tpu.memory_space<vmem>>, vector<16x32xf32>
    %cst = arith.constant dense<0xFF800000> : vector<16xf32>
    %1 = vector.multi_reduction <maximumf>, %0, %cst [1] : vector<16x32xf32> to vector<16xf32>
    %2 = vector.shape_cast %1 : vector<16xf32> to vector<16x1xf32>
    %3 = vector.broadcast %2 : vector<16x1xf32> to vector<16x32xf32>
    %4 = arith.subf %0, %3 : vector<16x32xf32>
    %5 = math.exp %4 : vector<16x32xf32>
    %cst_1 = arith.constant dense<0.000000e+00> : vector<16xf32>
    %6 = vector.multi_reduction <add>, %5, %cst_1 [1] : vector<16x32xf32> to vector<16xf32>
    %7 = vector.shape_cast %6 : vector<16xf32> to vector<16x1xf32>
    %cst_2 = arith.constant 3.500000e-01 : f32
    %8 = vector.broadcast %cst_2 : f32 to vector<16x1xf32>
    %9 = arith.mulf %7, %8 : vector<16x1xf32>
    %cst_3 = arith.constant 1.000000e+00 : f32
    %10 = vector.broadcast %cst_3 : f32 to vector<16x1xf32>
    %11 = arith.cmpf olt, %9, %10 : vector<16x1xf32>
    %12 = arith.extui %11 : vector<16x1xi1> to vector<16x1xi32>
    %c0_4 = arith.constant 0 : index
    %c0_5 = arith.constant 0 : index
    %13 = vector.load %arg2[%c0_4, %c0_5] : memref<16x1xi32, #tpu.memory_space<vmem>>, vector<16x1xi32>
    tpu.vector_store %arg2[%c0_4, %c0_5], %12 {strides = array<i32>} : memref<16x1xi32, #tpu.memory_space<vmem>>, vector<16x1xi32>,
    return
  }
  func.func @transform_0(%arg0: i32) -> (i32, i32) {
    %c0_i32 = arith.constant 0 : i32
    %c0_i32_0 = arith.constant 0 : i32
    return %arg0, %c0_i32 : i32, i32
  }
  func.func @transform_1(%arg0: i32) -> (i32, i32) {
    %c0_i32 = arith.constant 0 : i32
    %c0_i32_0 = arith.constant 0 : i32
    return %arg0, %c0_i32 : i32, i32
  }
}

</mosaic_0001>

<bundles_post_ra>
// kernel: tpu_custom_call.1
= control target key start
LH: loop header
LB: loop body
LE: loop exit
PB: predicated region body
PF: predicated region fallthrough
CT: control target
= control target key end

     0   :  { %6 = vsyncpa [#allocation3], 0  ;;  %s93_s9 = smov [#allocation2]   ;;  %s94_s11 = smov 128   ;;  %s120_s0 = inlined_call_operand.hbm [shape: f32[16,32], index: 0, kind: input, shape index: {}]   ;;  %s121_s1 = inlined_call_operand.vmem [shape: s32[16,1], index: 1, kind: output, shape index: {}]  }
   0x1   :  { %s11_s8 = sshll.u32 %s120_s0, 4  ;;  %s13_s10 = sshll.u32 %s93_s9, 4  ;;  %s12_s8 = int_to_ptr.hbm [resolvable:$true] %s11_s8  ;;  %s14_s10 = int_to_ptr.vmem [resolvable:$true] %s13_s10 }
   0x2   :  { %s95_s12 = smov 8  }
   0x3   :  { %19 = dma.hbm_to_vmem [thread:$0]  %s12_s8, 256, %s14_s10, [#allocation3], %s94_s11, %s94_s11, %s95_s12  }
   0x4   :  { %91 = dma.done.wait [#allocation3], 256  }
   0x5   :  { %92 = vsyncadd [#allocation3], 4294967040  ;;  %vm26_vm0 = vcmask 261120   ;;  %v24_v0 = vld [vmem:[#allocation2] sm:$0xff]  ;;  %v25_v2 = vld [vmem:[#allocation2 + $0x8] sm:$0xff]  ;;  %vm51_vm1 = vcmask 7168  }
   0x6   :  { %v27_v1 = vsel %vm26_vm0, %v24_v0, -inf  ;;  %v30_v3 = vsel %vm26_vm0, %v25_v2, -inf  ;;  %v96_v16 = vmov 0  }
   0x7   :  { %28 = vmax.xlane.f32.xlu0 %v27_v1 }
   0xf   :  { %31 = vmax.xlane.f32.xlu0 %v30_v3 }
  0x7a   :  { %v29_v4 = vpop.xlane.xlu0 %28 }
  0x7b   :  { %v33_v5 = vsub.f32 %v24_v0, %v29_v4 }
  0x7d   :  { %v35_v6 = vmul.f32 1.442695, %v33_v5 }
  0x7f   :  { %63 = vpow2.f32 %v35_v6 }
  0x82   :  { %v32_v7 = vpop.xlane.xlu0 %31 }
  0x83   :  { %v34_v8 = vsub.f32 %v25_v2, %v32_v7 }
  0x85   :  { %v64_v9 = vpop.eup %63  ;;  %v37_v10 = vmul.f32 1.442695, %v34_v8 }
  0x86   :  { %v39_v11 = vsel %vm26_vm0, %v64_v9, 0.0 }
  0x87   :  { %65 = vpow2.f32 %v37_v10  ;;  %40 = vadd.xlane.f32.xlu1 %v39_v11 }
  0x8d   :  { %v66_v12 = vpop.eup %65 }
  0x8e   :  { %v42_v13 = vsel %vm26_vm0, %v66_v12, 0.0 }
  0x8f   :  { %43 = vadd.xlane.f32.xlu1 %v42_v13 }
  0xfa   :  { %v41_v14 = vpop.xlane.xlu1 %40 }
  0xfb   :  { %v45_v15 = vmul.f32 0.35, %v41_v14 }
  0xfd   :  { %vm47_vm2 = vcmp.lt.f32.partialorder %v45_v15, 1.0 }
  0xfe   :  { %v49_v17 = vsel %vm47_vm2, 1, %v96_v16 }
  0xff   :  { %52 = vst.msk [vmem:[%s121_s1] sm:$0xff] %vm51_vm1, %v49_v17 }
 0x102   :  { %v44_v18 = vpop.xlane.xlu1 %43 }
 0x103   :  { %v46_v19 = vmul.f32 0.35, %v44_v18 }
 0x105   :  { %vm48_vm3 = vcmp.lt.f32.partialorder %v46_v19, 1.0 }
 0x106   :  { %v50_v20 = vsel %vm48_vm3, 1, %v96_v16 }
 0x107   :  { %53 = vst.msk [vmem:[%s121_s1 + $0x8] sm:$0xff] %vm51_vm1, %v50_v20 }
 0x108   :  { %58 = vsyncpa [#allocation3], 1 }

</bundles_post_ra>
